<compile_context>
chip_gen: v5e
topology: v5e:2x2
jax: 0.10.0
libtpu: 0.0.40
codegen_flags: <defaults>
</compile_context>

<pallas_src>
import jax
import jax.numpy as jnp
from jax.experimental import pallas as pl
from jax.experimental.pallas import tpu as pltpu

STATE_DIM = 3
HIDDEN = 128


def _round_up(n, m):
    return ((n + m - 1) // m) * m


def value_net_kernel(x_ref, w1_ref, b1_ref, w2_ref, b2_ref, w3r_ref, b3_ref, o_ref):
    # ---- Layer 1: Linear(STATE_DIM, 128) + ReLU  (VPU broadcast FMAs) ------
    # K = 3 is far too small for the MXU; three broadcast multiply-adds land in
    # VPU slots that are otherwise idle while the MXU runs layer 2.
    x = x_ref[...]                              # (TB, STATE_DIM) f32
    w1 = w1_ref[...]                            # (STATE_DIM, HIDDEN) f32
    h1 = x[:, 0:1] * w1[0:1, :]
    for k in range(1, STATE_DIM):
        h1 = h1 + x[:, k:k + 1] * w1[k:k + 1, :]
    h1 = jnp.maximum(h1 + b1_ref[...], 0.0)     # f32 (TB, HIDDEN)

    # ---- Layer 2: Linear(128, 128) + ReLU  (MXU, bf16 operands, f32 acc) ---
    h2 = jnp.dot(h1.astype(jnp.bfloat16), w2_ref[...],
                 preferred_element_type=jnp.float32)
    h2 = jnp.maximum(h2 + b2_ref[...], 0.0)     # f32 (TB, HIDDEN)

    # ---- Layer 3: Linear(128, 1)  (VPU multiply + lane reduction) ----------
    # N = 1 would use a single MXU column; a VPU mul + XLU reduce is free-ish.
    out = jnp.sum(h2 * w3r_ref[...], axis=-1, keepdims=True)   # (TB, 1) f32
    o_ref[...] = (out + b3_ref[0, 0]).astype(o_ref.dtype)


def value_network_forward(x, params, *, tb=1024):
    """x: [B, STATE_DIM] float32 -> [B, 1] float32."""
    w1, b1, w2, b2, w3, b3 = params
    B = x.shape[0]

    # Batch tile: multiple of 8 (sublane), capped so the f32 intermediates stay
    # comfortably inside VMEM on all generations (incl. v7x's 64 MiB).
    TB = min(_round_up(tb, 8), _round_up(B, 8))
    padded_B = _round_up(B, TB)
    if padded_B != B:
        x = jnp.pad(x, ((0, padded_B - B), (0, 0)))

    w2_bf16 = w2.astype(jnp.bfloat16)           # cast once outside the kernel
    w3_row = w3.reshape(1, HIDDEN)              # (1, 128) row for the VPU reduce

    grid = (padded_B // TB,)

    def fixed(shape):
        return pl.BlockSpec(shape, lambda i: (0,) * len(shape))

    flops = 2 * padded_B * (STATE_DIM * HIDDEN + HIDDEN * HIDDEN + HIDDEN)
    bytes_accessed = (
        padded_B * (STATE_DIM + 1) * 4
        + w1.size * 4 + b1.size * 4
        + w2_bf16.size * 2 + b2.size * 4
        + w3_row.size * 4 + b3.size * 4
    )

    out = pl.pallas_call(
        value_net_kernel,
        out_shape=jax.ShapeDtypeStruct((padded_B, 1), jnp.float32),
        grid=grid,
        in_specs=[
            pl.BlockSpec((TB, STATE_DIM), lambda i: (i, 0)),      # x: batch-tiled
            fixed(w1.shape),                                      # weights resident
            fixed(b1.shape),
            fixed(w2_bf16.shape),
            fixed(b2.shape),
            fixed(w3_row.shape),
            pl.BlockSpec(memory_space=pltpu.MemorySpace.SMEM),    # b3 scalar in SMEM
        ],
        out_specs=pl.BlockSpec((TB, 1), lambda i: (i, 0)),
        compiler_params=pltpu.CompilerParams(
            dimension_semantics=("parallel",),
            vmem_limit_bytes=32 * 1024 * 1024,
        ),
        cost_estimate=pl.CostEstimate(
            flops=flops, transcendentals=0, bytes_accessed=bytes_accessed),
    )(x, w1, b1, w2_bf16, b2, w3_row, b3)

    return out[:B]


def init_params(key):
    """Deterministic init matching PyTorch nn.Linear default (U[-1/sqrt(fan_in), +1/sqrt(fan_in)])."""
    ks = jax.random.split(key, 6)

    def linear(kw, kb, fan_in, fan_out):
        bound = 1.0 / jnp.sqrt(jnp.float32(fan_in))
        w = jax.random.uniform(kw, (fan_in, fan_out), jnp.float32, -bound, bound)
        b = jax.random.uniform(kb, (1, fan_out), jnp.float32, -bound, bound)
        return w, b

    w1, b1 = linear(ks[0], ks[1], STATE_DIM, HIDDEN)
    w2, b2 = linear(ks[2], ks[3], HIDDEN, HIDDEN)
    w3, b3 = linear(ks[4], ks[5], HIDDEN, 1)
    return (w1, b1, w2, b2, w3, b3)


def reference_forward(x, params):
    w1, b1, w2, b2, w3, b3 = params
    h1 = jnp.maximum(x @ w1 + b1, 0.0)
    h2 = jnp.maximum(h1 @ w2 + b2, 0.0)
    return h2 @ w3 + b3


if __name__ == "__main__":
    key = jax.random.PRNGKey(0)
    k_params, k_x = jax.random.split(key)
    params = init_params(k_params)

    # Small batch, single tile.
    B = 8
    x = jax.random.normal(k_x, (B, STATE_DIM), jnp.float32)
    out = jax.block_until_ready(value_network_forward(x, params))
    ref = reference_forward(x, params)
    assert out.shape == (B, 1)
    # bf16 MXU operands in layer 2 -> relaxed tolerance vs the f32 reference.
    assert jnp.allclose(out, ref, atol=2e-2, rtol=2e-2), "Pallas output mismatch vs reference"

    # Ragged batch (exercises pad + slice) with a small tile (multi-step grid).
    B2 = 20
    x2 = jax.random.normal(jax.random.PRNGKey(1), (B2, STATE_DIM), jnp.float32)
    out2 = jax.block_until_ready(value_network_forward(x2, params, tb=8))
    ref2 = reference_forward(x2, params)
    assert out2.shape == (B2, 1)
    assert jnp.allclose(out2, ref2, atol=2e-2, rtol=2e-2), "Pallas output mismatch vs reference (ragged)"

    print("KERNEL_OK")
</pallas_src>

<mosaic_0001>
module attributes {stable_mosaic.version = 11 : i64} {
  func.func @value_net_kernel(%arg0: i32, %arg1: memref<8x3xf32, #tpu.memory_space<vmem>>, %arg2: memref<3x128xf32, #tpu.memory_space<vmem>>, %arg3: memref<1x128xf32, #tpu.memory_space<vmem>>, %arg4: memref<128x128xbf16, #tpu.memory_space<vmem>>, %arg5: memref<1x128xf32, #tpu.memory_space<vmem>>, %arg6: memref<1x128xf32, #tpu.memory_space<vmem>>, %arg7: memref<1x1xf32, #tpu.memory_space<smem>>, %arg8: memref<8x1xf32, #tpu.memory_space<vmem>>) attributes {dimension_semantics = [#tpu.dimension_semantics<parallel>], iteration_bounds = array<i64: 1>, scalar_prefetch = 0 : i64, scratch_operands = 0 : i64, tpu.core_type = #tpu.core_type<tc>, window_params = [{transform_indices = @transform_0, window_bounds = array<i64: 8, 3>}, {pipeline_mode = #tpu.pipeline_mode<synchronous>, transform_indices = @transform_1, window_bounds = array<i64: 3, 128>}, {pipeline_mode = #tpu.pipeline_mode<synchronous>, transform_indices = @transform_2, window_bounds = array<i64: 1, 128>}, {pipeline_mode = #tpu.pipeline_mode<synchronous>, transform_indices = @transform_3, window_bounds = array<i64: 128, 128>}, {pipeline_mode = #tpu.pipeline_mode<synchronous>, transform_indices = @transform_4, window_bounds = array<i64: 1, 128>}, {pipeline_mode = #tpu.pipeline_mode<synchronous>, transform_indices = @transform_5, window_bounds = array<i64: 1, 128>}, {transform_indices = @transform_6, window_bounds = array<i64: 1, 1>}, {transform_indices = @transform_7, window_bounds = array<i64: 8, 1>}]} {
    %c0 = arith.constant 0 : index
    %c0_0 = arith.constant 0 : index
    %0 = vector.load %arg1[%c0, %c0_0] : memref<8x3xf32, #tpu.memory_space<vmem>>, vector<8x3xf32>
    %c0_1 = arith.constant 0 : index
    %c0_2 = arith.constant 0 : index
    %1 = vector.load %arg2[%c0_1, %c0_2] : memref<3x128xf32, #tpu.memory_space<vmem>>, vector<3x128xf32>
    %2 = vector.extract_strided_slice %0 {offsets = [0, 0], sizes = [8, 1], strides = [1, 1]} : vector<8x3xf32> to vector<8x1xf32>
    %3 = vector.extract_strided_slice %1 {offsets = [0, 0], sizes = [1, 128], strides = [1, 1]} : vector<3x128xf32> to vector<1x128xf32>
    %4 = vector.broadcast %2 : vector<8x1xf32> to vector<8x128xf32>
    %5 = vector.broadcast %3 : vector<1x128xf32> to vector<8x128xf32>
    %6 = arith.mulf %4, %5 : vector<8x128xf32>
    %7 = vector.extract_strided_slice %0 {offsets = [0, 1], sizes = [8, 1], strides = [1, 1]} : vector<8x3xf32> to vector<8x1xf32>
    %8 = vector.extract_strided_slice %1 {offsets = [1, 0], sizes = [1, 128], strides = [1, 1]} : vector<3x128xf32> to vector<1x128xf32>
    %9 = vector.broadcast %7 : vector<8x1xf32> to vector<8x128xf32>
    %10 = vector.broadcast %8 : vector<1x128xf32> to vector<8x128xf32>
    %11 = arith.mulf %9, %10 : vector<8x128xf32>
    %12 = arith.addf %6, %11 : vector<8x128xf32>
    %13 = vector.extract_strided_slice %0 {offsets = [0, 2], sizes = [8, 1], strides = [1, 1]} : vector<8x3xf32> to vector<8x1xf32>
    %14 = vector.extract_strided_slice %1 {offsets = [2, 0], sizes = [1, 128], strides = [1, 1]} : vector<3x128xf32> to vector<1x128xf32>
    %15 = vector.broadcast %13 : vector<8x1xf32> to vector<8x128xf32>
    %16 = vector.broadcast %14 : vector<1x128xf32> to vector<8x128xf32>
    %17 = arith.mulf %15, %16 : vector<8x128xf32>
    %18 = arith.addf %12, %17 : vector<8x128xf32>
    %c0_3 = arith.constant 0 : index
    %c0_4 = arith.constant 0 : index
    %19 = vector.load %arg3[%c0_3, %c0_4] : memref<1x128xf32, #tpu.memory_space<vmem>>, vector<1x128xf32>
    %20 = vector.broadcast %19 : vector<1x128xf32> to vector<8x128xf32>
    %21 = arith.addf %18, %20 : vector<8x128xf32>
    %cst = arith.constant 0.000000e+00 : f32
    %22 = vector.broadcast %cst : f32 to vector<8x128xf32>
    %23 = arith.maximumf %21, %22 : vector<8x128xf32>
    %24 = arith.truncf %23 : vector<8x128xf32> to vector<8x128xbf16>
    %c0_5 = arith.constant 0 : index
    %c0_6 = arith.constant 0 : index
    %25 = vector.load %arg4[%c0_5, %c0_6] : memref<128x128xbf16, #tpu.memory_space<vmem>>, vector<128x128xbf16>
    %cst_7 = arith.constant dense<0.000000e+00> : vector<8x128xf32>
    %26 = tpu.matmul %24, %25, %cst_7 {dimension_numbers = #tpu.dot_dimension_numbers<[1], [0], [0], [1], [0, 0, 1, 1], [], []>} : vector<8x128xbf16>, vector<128x128xbf16>, vector<8x128xf32> -> vector<8x128xf32>
    %c0_8 = arith.constant 0 : index
    %c0_9 = arith.constant 0 : index
    %27 = vector.load %arg5[%c0_8, %c0_9] : memref<1x128xf32, #tpu.memory_space<vmem>>, vector<1x128xf32>
    %28 = vector.broadcast %27 : vector<1x128xf32> to vector<8x128xf32>
    %29 = arith.addf %26, %28 : vector<8x128xf32>
    %cst_10 = arith.constant 0.000000e+00 : f32
    %30 = vector.broadcast %cst_10 : f32 to vector<8x128xf32>
    %31 = arith.maximumf %29, %30 : vector<8x128xf32>
    %c0_11 = arith.constant 0 : index
    %c0_12 = arith.constant 0 : index
    %32 = vector.load %arg6[%c0_11, %c0_12] : memref<1x128xf32, #tpu.memory_space<vmem>>, vector<1x128xf32>
    %33 = vector.broadcast %32 : vector<1x128xf32> to vector<8x128xf32>
    %34 = arith.mulf %31, %33 : vector<8x128xf32>
    %cst_13 = arith.constant dense<0.000000e+00> : vector<8xf32>
    %35 = vector.multi_reduction <add>, %34, %cst_13 [1] : vector<8x128xf32> to vector<8xf32>
    %36 = vector.shape_cast %35 : vector<8xf32> to vector<8x1xf32>
    %c0_14 = arith.constant 0 : index
    %c0_15 = arith.constant 0 : index
    %37 = memref.load %arg7[%c0_14, %c0_15] : memref<1x1xf32, #tpu.memory_space<smem>>
    %38 = vector.broadcast %37 : f32 to vector<8x1xf32>
    %39 = arith.addf %36, %38 : vector<8x1xf32>
    %c0_16 = arith.constant 0 : index
    %c0_17 = arith.constant 0 : index
    %40 = vector.load %arg8[%c0_16, %c0_17] : memref<8x1xf32, #tpu.memory_space<vmem>>, vector<8x1xf32>
    tpu.vector_store %arg8[%c0_16, %c0_17], %39 {strides = array<i32>} : memref<8x1xf32, #tpu.memory_space<vmem>>, vector<8x1xf32>,
    return
  }
  func.func @transform_0(%arg0: i32) -> (i32, i32) {
    %c0_i32 = arith.constant 0 : i32
    %c0_i32_0 = arith.constant 0 : i32
    return %arg0, %c0_i32 : i32, i32
  }
  func.func @transform_1(%arg0: i32) -> (i32, i32) {
    %c0_i32 = arith.constant 0 : i32
    %c0_i32_0 = arith.constant 0 : i32
    %c0_i32_1 = arith.constant 0 : i32
    return %c0_i32, %c0_i32_0 : i32, i32
  }
  func.func @transform_2(%arg0: i32) -> (i32, i32) {
    %c0_i32 = arith.constant 0 : i32
    %c0_i32_0 = arith.constant 0 : i32
    %c0_i32_1 = arith.constant 0 : i32
    return %c0_i32, %c0_i32_0 : i32, i32
  }
  func.func @transform_3(%arg0: i32) -> (i32, i32) {
    %c0_i32 = arith.constant 0 : i32
    %c0_i32_0 = arith.constant 0 : i32
    %c0_i32_1 = arith.constant 0 : i32
    return %c0_i32, %c0_i32_0 : i32, i32
  }
  func.func @transform_4(%arg0: i32) -> (i32, i32) {
    %c0_i32 = arith.constant 0 : i32
    %c0_i32_0 = arith.constant 0 : i32
    %c0_i32_1 = arith.constant 0 : i32
    return %c0_i32, %c0_i32_0 : i32, i32
  }
  func.func @transform_5(%arg0: i32) -> (i32, i32) {
    %c0_i32 = arith.constant 0 : i32
    %c0_i32_0 = arith.constant 0 : i32
    %c0_i32_1 = arith.constant 0 : i32
    return %c0_i32, %c0_i32_0 : i32, i32
  }
  func.func @transform_6(%arg0: i32) -> (i32, i32) {
    %c0_i32 = arith.constant 0 : i32
    %c0_i32_0 = arith.constant 0 : i32
    %c0_i32_1 = arith.constant 0 : i32
    return %c0_i32, %c0_i32_0 : i32, i32
  }
  func.func @transform_7(%arg0: i32) -> (i32, i32) {
    %c0_i32 = arith.constant 0 : i32
    %c0_i32_0 = arith.constant 0 : i32
    return %arg0, %c0_i32 : i32, i32
  }
}

</mosaic_0001>

<bundles_post_ra>
// kernel: tpu_custom_call.1
= control target key start
LH: loop header
LB: loop body
LE: loop exit
PB: predicated region body
PF: predicated region fallthrough
CT: control target
= control target key end

     0   :  { %13 = vsyncpa [#allocation4], 0  ;;  %s251_s27 = smov [#allocation3]   ;;  %s252_s29 = smov 64   ;;  %s321_s0 = inlined_call_operand.vmem [shape: f32[8,3], index: 0, kind: input, shape index: {}]   ;;  %s322_s1 = inlined_call_operand.vmem [shape: f32[3,128], index: 1, kind: input, shape index: {}]   ;;  %s323_s2 = inlined_call_operand.vmem [shape: f32[1,128], index: 2, kind: input, shape index: {}]   ;;  %s324_s3 = inlined_call_operand.hbm [shape: bf16[128,128], index: 3, kind: input, shape index: {}]   ;;  %s325_s4 = inlined_call_operand.vmem [shape: f32[1,128], index: 4, kind: input, shape index: {}]   ;;  %s326_s5 = inlined_call_operand.vmem [shape: f32[1,128], index: 5, kind: input, shape index: {}]   ;;  %s327_s6 = inlined_call_operand.<no memory space> [shape: f32[1,1], index: 6, kind: input, shape index: {}]   ;;  %s328_s7 = inlined_call_operand.vmem [shape: f32[8,1], index: 7, kind: output, shape index: {}]  }
   0x1   :  { %s24_s26 = sshll.u32 %s324_s3, 4  ;;  %s26_s28 = sshll.u32 %s251_s27, 4  ;;  %s25_s26 = int_to_ptr.hbm [resolvable:$true] %s24_s26  ;;  %s27_s28 = int_to_ptr.vmem [resolvable:$true] %s26_s28 }
   0x2   :  { %s253_s30 = smov 4  }
   0x3   :  { %32 = dma.hbm_to_vmem [thread:$0]  %s25_s26, 1024, %s27_s28, [#allocation4], %s252_s29, %s252_s29, %s253_s30  }
   0x4   :  { %249 = dma.done.wait [#allocation4], 1024  }
   0x5   :  { %250 = vsyncadd [#allocation4], 4294966272  ;;  %v254_v0 = vmov 0   ;;  %v255_v1 = vmov 2   ;;  %v43_v2 = vld [vmem:[%s321_s0] sm:$0xff]  ;;  %v211_v3 = vld [vmem:[#allocation3 + $0x38] sm:$0xff]  ;;  %v163_v35 = vstv %s327_s6 }
   0x6   :  { %218 = vset.pattern.permute.xlu0 %v254_v0  ;;  %220 = vset.pattern.permute.xlu1 %v255_v1  ;;  %v210_v4 = vld [vmem:[#allocation3 + $0x30] sm:$0xff]  ;;  %v209_v5 = vld [vmem:[#allocation3 + $0x28] sm:$0xff]  ;;  %v256_v6 = vmov 1   ;;  %v208_v7 = vld [vmem:[#allocation3 + $0x20] sm:$0xff]  ;;  %vm165_vm0 = vcmask 7168  }
   0x7   :  { %47 = vperm.xlu0 %218, %v43_v2   ;;  %60 = vperm.xlu1 %220, %v43_v2   ;;  %v207_v8 = vld [vmem:[#allocation3 + $0x18] sm:$0xff]  ;;  %v206_v9 = vld [vmem:[#allocation3 + $0x10] sm:$0xff]  ;;  %v205_v10 = vld [vmem:[#allocation3 + $0x8] sm:$0xff] }
   0x8   :  { %141 = vmatpush.bf16.msra.mxu0 %v211_v3  ;;  %v204_v11 = vld [vmem:[#allocation3] sm:$0xff] }
   0x9   :  { %v44_v13 = vld [vmem:[%s322_s1] sm:$0x7] }
   0xa   :  { %v50_v14 = vperm.slane %v44_v13, 0  ;;  %v56_v15 = vperm.slane %v44_v13, 1  ;;  %v63_v16 = vperm.slane %v44_v13, 2  ;;  %v222_v23 = vld [vmem:[%s323_s2] ss:$0 sm:$0xff] }
   0xb   :  { %v223_v28 = vld [vmem:[%s325_s4] ss:$0 sm:$0xff] }
   0xc   :  { %142 = vmatpush.bf16.msra.mxu0 %v210_v4  ;;  %v224_v31 = vld [vmem:[%s326_s5] ss:$0 sm:$0xff] }
   0xf   :  { %219 = vset.pattern.permute.xlu0 %v256_v6 }
  0x10   :  { %53 = vperm.xlu0 %219, %v43_v2   ;;  %143 = vmatpush.bf16.msra.mxu0 %v209_v5 }
  0x14   :  { %144 = vmatpush.bf16.msra.mxu0 %v208_v7 }
  0x18   :  { %221 = vset.pattern.permute.xlu0 %v255_v1  ;;  %145 = vmatpush.bf16.msra.mxu0 %v207_v8 }
  0x1c   :  { %146 = vmatpush.bf16.msra.mxu0 %v206_v9 }
  0x20   :  { %147 = vmatpush.bf16.msra.mxu0 %v205_v10 }
  0x24   :  { %148 = vmatpush.bf16.msra.mxu0 %v204_v11 }
  0x79   :  { %v48_v12 = vpop.permute.xlu0 %47  ;;  %v61_v17 = vpop.permute.xlu1 %60 }
  0x7a   :  { %v51_v19 = vmul.f32 %v50_v14, %v48_v12  ;;  %v64_v21 = vmul.f32 %v63_v16, %v61_v17 }
  0x82   :  { %v54_v18 = vpop.permute.xlu0 %53 }
  0x83   :  { %v57_v20 = vmul.f32 %v56_v15, %v54_v18 }
  0x85   :  { %v58_v22 = vadd.f32 %v57_v20, %v51_v19 }
  0x87   :  { %v65_v24 = vadd.f32 %v64_v21, %v58_v22 }
  0x89   :  { %v70_v25 = vadd.f32 %v222_v23, %v65_v24 }
  0x8b   :  { %v71_v26 = vmax.f32 %v70_v25, 0.0 }
  0x8d   :  { %v72_v27 = vpack.c.bf16 %v71_v26, %v71_v26 }
  0x8f   :  { %149 = vmatmul.bf16.vlgmr.msra.gmra.mxu0 %v72_v27 }
 0x10c   :  { %v150_v29 = vpop.f32.mrf.mxu0 }
 0x10d   :  { %v151_v30 = vadd.f32 %v223_v28, %v150_v29 }
 0x10f   :  { %v154_v32 = vmax.f32 %v151_v30, 0.0 }
 0x111   :  { %v159_v33 = vmul.f32 %v224_v31, %v154_v32 }
 0x113   :  { %160 = vadd.xlane.f32.xlu1 %v159_v33 }
 0x114   :  { %v152_v34 = vpop.f32.mrf.mxu0 }
 0x186   :  { %v161_v36 = vpop.xlane.xlu1 %160 }
 0x187   :  { %v164_v37 = vadd.f32 %v163_v35, %v161_v36 }
 0x189   :  { %166 = vst.msk [vmem:[%s328_s7] sm:$0xff] %vm165_vm0, %v164_v37 }
 0x18a   :  { %171 = vsyncpa [#allocation4], 1 }

</bundles_post_ra>
